<compile_context>
chip_gen: v6e
topology: v6e:2x2x1
jax: 0.10.0
libtpu: 0.0.40
codegen_flags: <defaults>
</compile_context>

<pallas_src>
import functools

import jax
import jax.numpy as jnp
from jax import lax
from jax.experimental import pallas as pl
from jax.experimental.pallas import tpu as pltpu

NUM_CLASSES = 10
IN_FEATURES = 64     # Flatten of (1, 8, 8)
H1 = 128             # first hidden width (already lane-dense)
H2 = 16              # second hidden width in the PyTorch model
LANE = 128           # padded width for hidden-2 and class dims
ROW_TILE = 16        # bf16 min sublane tile for the (TB, 128) output block


def _round_up(n, m):
    return (n + m - 1) // m * m


def _mlp_softmax_kernel(x_ref, w1_ref, w23_ref, b_ref, o_ref, *, num_classes):
    """Fused 3-layer MLP + ReLU + masked softmax on one (TB, 64) batch tile.

    x_ref   : (TB, 64)       f32   (cast to bf16 in-kernel; VPU, hidden by DMA)
    w1_ref  : (64, 128)      bf16
    w23_ref : (2, 128, 128)  bf16   [0] = padded W2, [1] = padded W3
    b_ref   : (3, 128)       f32    rows = padded b1, b2, b3
    o_ref   : (TB, 128)      bf16   lane-dense; cols >= num_classes are 0
    """
    x = x_ref[...].astype(jnp.bfloat16)                      # in-kernel cast
    b1 = b_ref[0:1, :]                                       # (1, 128) f32
    b2 = b_ref[1:2, :]
    b3 = b_ref[2:3, :]

    # Linear(64, 128) + ReLU  (MXU bf16 -> f32 accumulate, elementwise in f32)
    h1 = jnp.dot(x, w1_ref[...], preferred_element_type=jnp.float32)
    h1 = jnp.maximum(h1 + b1, 0.0)                           # (TB, 128) f32

    # Linear(128, 16) + ReLU, computed at padded width 128 (zeros are inert)
    h2 = jnp.dot(h1.astype(jnp.bfloat16), w23_ref[0],
                 preferred_element_type=jnp.float32)
    h2 = jnp.maximum(h2 + b2, 0.0)                           # (TB, 128) f32

    # Linear(16, num_classes) + ReLU, padded to 128 output lanes.
    # TODO(synk): v5e-only — if profiling shows MXU-bound after the bf16
    # writeback change, slice the contraction to K=16 / trim the padded MXU
    # work; on v6e/v7x the padding is fully hidden under HBM DMA.
    h3 = jnp.dot(h2.astype(jnp.bfloat16), w23_ref[1],
                 preferred_element_type=jnp.float32)
    h3 = jnp.maximum(h3 + b3, 0.0)                           # (TB, 128) f32

    # Softmax over the real class lanes only; padded lanes masked to -1e30 so
    # exp() underflows to 0 and does not pollute the denominator.
    lane_idx = lax.broadcasted_iota(jnp.int32, h3.shape, 1)
    logits = jnp.where(lane_idx < num_classes, h3, jnp.float32(-1e30))
    m = jnp.max(logits, axis=-1, keepdims=True)
    e = jnp.exp(logits - m)
    denom = jnp.sum(e, axis=-1, keepdims=True)
    probs = e * pl.reciprocal(denom, approx=True)            # EUP slot
    # TODO(synk): if the consumer is a loss/argmax, fuse it here instead of
    # writing the full (TB,128) probability slab.
    o_ref[...] = probs.astype(jnp.bfloat16)                  # halve writeback


def _prepare_kernel_params(params, num_classes):
    """(in, out)-layout f32 params -> padded / stacked bf16 kernel operands."""
    w1, b1, w2, b2, w3, b3 = params

    w1p = w1.astype(jnp.bfloat16)                                   # (64,128)
    w2p = jnp.zeros((H1, LANE), jnp.float32).at[:, :H2].set(w2)
    w3p = jnp.zeros((LANE, LANE), jnp.float32).at[:H2, :num_classes].set(w3)
    w23 = jnp.stack([w2p, w3p]).astype(jnp.bfloat16)                # (2,128,128)

    b1p = b1.reshape(1, -1).astype(jnp.float32)                     # (1,128)
    b2p = jnp.zeros((1, LANE), jnp.float32).at[:, :H2].set(b2.reshape(1, -1))
    b3p = jnp.zeros((1, LANE), jnp.float32).at[:, :num_classes].set(
        b3.reshape(1, -1))
    biases = jnp.concatenate([b1p, b2p, b3p], axis=0)               # (3,128)
    return w1p, w23, biases


def vanilla_classifier_forward(x_nchw, params, num_classes=NUM_CLASSES,
                               max_block_b=4096):
    """x_nchw: (B, C, H, W) with C*H*W == 64. Returns (B, num_classes) bf16."""
    b = x_nchw.shape[0]
    x2d = x_nchw.reshape(b, -1)                # Flatten only; no cast, no pad
    assert x2d.shape[1] == IN_FEATURES

    # Batch tiling: tiles are multiples of 16 rows (bf16 output sublane tile),
    # as large as max_block_b, and the grid has an even number (>=2) of steps
    # whenever the batch allows it so v7x's 2 TensorCores both get work.
    b16 = _round_up(b, ROW_TILE)
    if b16 <= ROW_TILE:
        n_steps = 1
    else:
        n_steps = max(2, pl.cdiv(b16, max_block_b))
        n_steps += n_steps % 2                      # even split across 2 TCs
    tb = _round_up(pl.cdiv(b16, n_steps), ROW_TILE)
    b_pad = tb * n_steps
    if b_pad != b:
        x2d = jnp.pad(x2d, ((0, b_pad - b), (0, 0)))   # only when B % tb != 0

    w1p, w23, biases = _prepare_kernel_params(params, num_classes)

    out = pl.pallas_call(
        functools.partial(_mlp_softmax_kernel, num_classes=num_classes),
        out_shape=jax.ShapeDtypeStruct((b_pad, LANE), jnp.bfloat16),
        grid=(n_steps,),
        in_specs=[
            pl.BlockSpec((tb, IN_FEATURES), lambda i: (i, 0)),      # x tiles
            pl.BlockSpec((IN_FEATURES, H1), lambda i: (0, 0)),      # W1 resident
            pl.BlockSpec((2, H1, LANE), lambda i: (0, 0, 0)),       # W2|W3 resident
            pl.BlockSpec((3, LANE), lambda i: (0, 0)),              # biases resident
        ],
        out_specs=pl.BlockSpec((tb, LANE), lambda i: (i, 0)),       # lane-dense
        compiler_params=pltpu.CompilerParams(
            dimension_semantics=("parallel",)),
    )(x2d, w1p, w23, biases)

    return out[:b, :num_classes]


def init_params(key, num_classes=NUM_CLASSES):
    """Deterministic PyTorch-style (uniform +-1/sqrt(fan_in)) init, f32,
    stored as (in_features, out_features)."""
    dims = [(IN_FEATURES, H1), (H1, H2), (H2, num_classes)]
    params = []
    for i, (fan_in, fan_out) in enumerate(dims):
        kw, kb, key = jax.random.split(jax.random.fold_in(key, i), 3)
        bound = 1.0 / (fan_in ** 0.5)
        w = jax.random.uniform(kw, (fan_in, fan_out), jnp.float32,
                               -bound, bound)
        bvec = jax.random.uniform(kb, (1, fan_out), jnp.float32, -bound, bound)
        params.extend([w, bvec])
    return tuple(params)


if __name__ == "__main__":
    key = jax.random.PRNGKey(0)
    k_x, k_p = jax.random.split(key)

    # Small input consistent with Flatten -> Linear(64, ...): (B=8, 1, 8, 8)
    x = jax.random.normal(k_x, (8, 1, 8, 8), dtype=jnp.float32)
    params = init_params(k_p)

    y = vanilla_classifier_forward(x, params)
    jax.block_until_ready(y)

    assert y.shape == (8, NUM_CLASSES)
    y32 = y.astype(jnp.float32)

    # Softmax rows sum to ~1 (bf16 store + approx reciprocal -> loose tol).
    assert bool(jnp.allclose(jnp.sum(y32, axis=-1), 1.0, atol=2e-2))

    # Pure-JAX f32 reference (loose tol: kernel uses bf16 weights/activations
    # and a bf16 output store).
    w1, b1, w2, b2, w3, b3 = params
    h = jnp.maximum(x.reshape(8, -1) @ w1 + b1, 0.0)
    h = jnp.maximum(h @ w2 + b2, 0.0)
    h = jnp.maximum(h @ w3 + b3, 0.0)
    ref = jax.nn.softmax(h, axis=-1)
    assert bool(jnp.allclose(y32, ref, atol=4e-2))

    print("KERNEL_OK")
</pallas_src>

<mosaic_0001>
module attributes {stable_mosaic.version = 11 : i64} {
  func.func @_mlp_softmax_kernel(%arg0: i32, %arg1: memref<16x64xf32, #tpu.memory_space<vmem>>, %arg2: memref<64x128xbf16, #tpu.memory_space<vmem>>, %arg3: memref<2x128x128xbf16, #tpu.memory_space<vmem>>, %arg4: memref<3x128xf32, #tpu.memory_space<vmem>>, %arg5: memref<16x128xbf16, #tpu.memory_space<vmem>>) attributes {dimension_semantics = [#tpu.dimension_semantics<parallel>], iteration_bounds = array<i64: 1>, scalar_prefetch = 0 : i64, scratch_operands = 0 : i64, tpu.core_type = #tpu.core_type<tc>, window_params = [{transform_indices = @transform_0, window_bounds = array<i64: 16, 64>}, {pipeline_mode = #tpu.pipeline_mode<synchronous>, transform_indices = @transform_1, window_bounds = array<i64: 64, 128>}, {pipeline_mode = #tpu.pipeline_mode<synchronous>, transform_indices = @transform_2, window_bounds = array<i64: 2, 128, 128>}, {pipeline_mode = #tpu.pipeline_mode<synchronous>, transform_indices = @transform_3, window_bounds = array<i64: 3, 128>}, {transform_indices = @transform_4, window_bounds = array<i64: 16, 128>}]} {
    %c0 = arith.constant 0 : index
    %c0_0 = arith.constant 0 : index
    %0 = vector.load %arg1[%c0, %c0_0] : memref<16x64xf32, #tpu.memory_space<vmem>>, vector<16x64xf32>
    %1 = arith.truncf %0 : vector<16x64xf32> to vector<16x64xbf16>
    %c0_1 = arith.constant 0 : index
    %c0_2 = arith.constant 0 : index
    %2 = vector.load %arg4[%c0_1, %c0_2] : memref<3x128xf32, #tpu.memory_space<vmem>>, vector<1x128xf32>
    %c1 = arith.constant 1 : index
    %c0_3 = arith.constant 0 : index
    %3 = vector.load %arg4[%c1, %c0_3] : memref<3x128xf32, #tpu.memory_space<vmem>>, vector<1x128xf32>
    %c2 = arith.constant 2 : index
    %c0_4 = arith.constant 0 : index
    %4 = vector.load %arg4[%c2, %c0_4] : memref<3x128xf32, #tpu.memory_space<vmem>>, vector<1x128xf32>
    %c0_5 = arith.constant 0 : index
    %c0_6 = arith.constant 0 : index
    %5 = vector.load %arg2[%c0_5, %c0_6] : memref<64x128xbf16, #tpu.memory_space<vmem>>, vector<64x128xbf16>
    %cst = arith.constant dense<0.000000e+00> : vector<16x128xf32>
    %6 = tpu.matmul %1, %5, %cst {dimension_numbers = #tpu.dot_dimension_numbers<[1], [0], [0], [1], [0, 0, 1, 1], [], []>} : vector<16x64xbf16>, vector<64x128xbf16>, vector<16x128xf32> -> vector<16x128xf32>
    %7 = vector.broadcast %2 : vector<1x128xf32> to vector<16x128xf32>
    %8 = arith.addf %6, %7 : vector<16x128xf32>
    %cst_7 = arith.constant 0.000000e+00 : f32
    %9 = vector.broadcast %cst_7 : f32 to vector<16x128xf32>
    %10 = arith.maximumf %8, %9 : vector<16x128xf32>
    %11 = arith.truncf %10 : vector<16x128xf32> to vector<16x128xbf16>
    %c0_8 = arith.constant 0 : index
    %c0_9 = arith.constant 0 : index
    %c0_10 = arith.constant 0 : index
    %12 = vector.load %arg3[%c0_8, %c0_9, %c0_10] : memref<2x128x128xbf16, #tpu.memory_space<vmem>>, vector<1x128x128xbf16>
    %13 = vector.shape_cast %12 : vector<1x128x128xbf16> to vector<128x128xbf16>
    %cst_11 = arith.constant dense<0.000000e+00> : vector<16x128xf32>
    %14 = tpu.matmul %11, %13, %cst_11 {dimension_numbers = #tpu.dot_dimension_numbers<[1], [0], [0], [1], [0, 0, 1, 1], [], []>} : vector<16x128xbf16>, vector<128x128xbf16>, vector<16x128xf32> -> vector<16x128xf32>
    %15 = vector.broadcast %3 : vector<1x128xf32> to vector<16x128xf32>
    %16 = arith.addf %14, %15 : vector<16x128xf32>
    %cst_12 = arith.constant 0.000000e+00 : f32
    %17 = vector.broadcast %cst_12 : f32 to vector<16x128xf32>
    %18 = arith.maximumf %16, %17 : vector<16x128xf32>
    %19 = arith.truncf %18 : vector<16x128xf32> to vector<16x128xbf16>
    %c1_13 = arith.constant 1 : index
    %c0_14 = arith.constant 0 : index
    %c0_15 = arith.constant 0 : index
    %20 = vector.load %arg3[%c1_13, %c0_14, %c0_15] : memref<2x128x128xbf16, #tpu.memory_space<vmem>>, vector<1x128x128xbf16>
    %21 = vector.shape_cast %20 : vector<1x128x128xbf16> to vector<128x128xbf16>
    %cst_16 = arith.constant dense<0.000000e+00> : vector<16x128xf32>
    %22 = tpu.matmul %19, %21, %cst_16 {dimension_numbers = #tpu.dot_dimension_numbers<[1], [0], [0], [1], [0, 0, 1, 1], [], []>} : vector<16x128xbf16>, vector<128x128xbf16>, vector<16x128xf32> -> vector<16x128xf32>
    %23 = vector.broadcast %4 : vector<1x128xf32> to vector<16x128xf32>
    %24 = arith.addf %22, %23 : vector<16x128xf32>
    %cst_17 = arith.constant 0.000000e+00 : f32
    %25 = vector.broadcast %cst_17 : f32 to vector<16x128xf32>
    %26 = arith.maximumf %24, %25 : vector<16x128xf32>
    %27 = tpu.iota {dimensions = array<i32: 1>} : vector<16x128xi32>
    %c10_i32 = arith.constant 10 : i32
    %28 = vector.broadcast %c10_i32 : i32 to vector<16x128xi32>
    %29 = arith.cmpi slt, %27, %28 : vector<16x128xi32>
    %cst_18 = arith.constant -1.000000e+30 : f32
    %30 = vector.broadcast %cst_18 : f32 to vector<16x128xf32>
    %31 = arith.select %29, %26, %30 : vector<16x128xi1>, vector<16x128xf32>
    %cst_19 = arith.constant dense<0xFF800000> : vector<16xf32>
    %32 = vector.multi_reduction <maximumf>, %31, %cst_19 [1] : vector<16x128xf32> to vector<16xf32>
    %33 = vector.shape_cast %32 : vector<16xf32> to vector<16x1xf32>
    %34 = vector.broadcast %33 : vector<16x1xf32> to vector<16x128xf32>
    %35 = arith.subf %31, %34 : vector<16x128xf32>
    %36 = math.exp %35 : vector<16x128xf32>
    %cst_20 = arith.constant dense<0.000000e+00> : vector<16xf32>
    %37 = vector.multi_reduction <add>, %36, %cst_20 [1] : vector<16x128xf32> to vector<16xf32>
    %38 = vector.shape_cast %37 : vector<16xf32> to vector<16x1xf32>
    %39 = tpu.reciprocal %38 {approx = true} : vector<16x1xf32> -> vector<16x1xf32>
    %40 = vector.broadcast %39 : vector<16x1xf32> to vector<16x128xf32>
    %41 = arith.mulf %36, %40 : vector<16x128xf32>
    %42 = arith.truncf %41 : vector<16x128xf32> to vector<16x128xbf16>
    %c0_21 = arith.constant 0 : index
    %c0_22 = arith.constant 0 : index
    %43 = vector.load %arg5[%c0_21, %c0_22] : memref<16x128xbf16, #tpu.memory_space<vmem>>, vector<16x128xbf16>
    tpu.vector_store %arg5[%c0_21, %c0_22], %42 {strides = array<i32>} : memref<16x128xbf16, #tpu.memory_space<vmem>>, vector<16x128xbf16>,
    return
  }
  func.func @transform_0(%arg0: i32) -> (i32, i32) {
    %c0_i32 = arith.constant 0 : i32
    %c0_i32_0 = arith.constant 0 : i32
    return %arg0, %c0_i32 : i32, i32
  }
  func.func @transform_1(%arg0: i32) -> (i32, i32) {
    %c0_i32 = arith.constant 0 : i32
    %c0_i32_0 = arith.constant 0 : i32
    %c0_i32_1 = arith.constant 0 : i32
    return %c0_i32, %c0_i32_0 : i32, i32
  }
  func.func @transform_2(%arg0: i32) -> (i32, i32, i32) {
    %c0_i32 = arith.constant 0 : i32
    %c0_i32_0 = arith.constant 0 : i32
    %c0_i32_1 = arith.constant 0 : i32
    %c0_i32_2 = arith.constant 0 : i32
    return %c0_i32, %c0_i32_0, %c0_i32_1 : i32, i32, i32
  }
  func.func @transform_3(%arg0: i32) -> (i32, i32) {
    %c0_i32 = arith.constant 0 : i32
    %c0_i32_0 = arith.constant 0 : i32
    %c0_i32_1 = arith.constant 0 : i32
    return %c0_i32, %c0_i32_0 : i32, i32
  }
  func.func @transform_4(%arg0: i32) -> (i32, i32) {
    %c0_i32 = arith.constant 0 : i32
    %c0_i32_0 = arith.constant 0 : i32
    return %arg0, %c0_i32 : i32, i32
  }
}

</mosaic_0001>

<bundles_post_ra>
// kernel: tpu_custom_call.1
= control target key start
LH: loop header
LB: loop body
LE: loop exit
PB: predicated region body
PF: predicated region fallthrough
CT: control target
= control target key end

     0   :  { %9 = vsyncpa [#allocation3], 0  ;;  %s748_s0 = inlined_call_operand.hbm [shape: f32[16,64], index: 0, kind: input, shape index: {}]   ;;  %s749_s1 = inlined_call_operand.hbm [shape: bf16[64,128], index: 1, kind: input, shape index: {}]   ;;  %s750_s2 = inlined_call_operand.hbm [shape: bf16[2,128,128], index: 2, kind: input, shape index: {}]   ;;  %s751_s3 = inlined_call_operand.vmem [shape: f32[3,128], index: 3, kind: input, shape index: {}]   ;;  %s752_s4 = inlined_call_operand.hbm [shape: bf16[16,128], index: 4, kind: output, shape index: {}]  }
   0x1   :  { %10 = vsyncpa [#allocation6], 0 }
   0x2   :  { %11 = vsyncpa [#allocation4], 0  ;;  %s657_s15 = smov [#allocation5]  }
   0x3   :  { %s29_s16 = sshll.u32 %s657_s15, 4  ;;  %s30_s16 = int_to_ptr.vmem [resolvable:$true] %s29_s16 }
   0x4   :  { %s579_s17 = scalar_lea.vmem %s30_s16, 512  ;;  %p584_p1 = scmp.lt.s32.totalorder %s30_s16, %s30_s16 }
   0x5   :  { %p580_p0 = scmp.ne.s32.totalorder %s30_s16, %s579_s17  ;;  %p585_p2 = scmp.lt.s32.totalorder %s579_s17, %s579_s17 }
   0x7   :  { %p586_p3 = por %p585_p2, %p584_p1 }
   0x9   :  { %p587_p4 = pnand %p586_p3, %p580_p0 }
   0xb   :  { %590 = shalt.err (!%p587_p4)
}
   0xc   :  { %s658_s18 = smov 64   ;;  %s659_s19 = smov 4  }
   0xd   :  { %35 = dma.hbm_to_vmem [thread:$0]  %s749_s1, 512, %s30_s16, [#allocation6], %s658_s18, %s658_s18, %s659_s19  }
   0xe   :  { %s660_s22 = smov [#allocation2]  }
   0xf   :  { %s17_s23 = sshll.u32 %s660_s22, 4  ;;  %s18_s23 = int_to_ptr.vmem [resolvable:$true] %s17_s23 }
  0x10   :  { %s599_s24 = scalar_lea.vmem %s18_s23, 256  ;;  %p604_p6 = scmp.lt.s32.totalorder %s18_s23, %s18_s23 }
  0x11   :  { %p600_p5 = scmp.ne.s32.totalorder %s18_s23, %s599_s24  ;;  %p605_p7 = scmp.lt.s32.totalorder %s599_s24, %s599_s24 }
  0x13   :  { %p606_p8 = por %p605_p7, %p604_p6 }
  0x15   :  { %p607_p9 = pnand %p606_p8, %p600_p5 }
  0x17   :  { %610 = shalt.err (!%p607_p9)
}
  0x18   :  { %s661_s25 = smov 128   ;;  %s662_s26 = smov 8  }
  0x19   :  { %23 = dma.hbm_to_vmem [thread:$0]  %s748_s0, 256, %s18_s23, [#allocation3], %s661_s25, %s661_s25, %s662_s26  }
  0x1a   :  { %s663_s29 = smov [#allocation7]  }
  0x1b   :  { %s41_s30 = sshll.u32 %s663_s29, 4  ;;  %s42_s30 = int_to_ptr.vmem [resolvable:$true] %s41_s30 }
  0x1c   :  { %s619_s1 = scalar_lea.vmem %s42_s30, 2048  ;;  %p624_p11 = scmp.lt.s32.totalorder %s42_s30, %s42_s30 }
  0x1d   :  { %p620_p10 = scmp.ne.s32.totalorder %s42_s30, %s619_s1  ;;  %p625_p12 = scmp.lt.s32.totalorder %s619_s1, %s619_s1 }
  0x1f   :  { %p626_p13 = por %p625_p12, %p624_p11 }
  0x21   :  { %p627_p0 = pnand %p626_p13, %p620_p10 }
  0x23   :  { %630 = shalt.err (!%p627_p0)
}
  0x24   :  { %47 = dma.hbm_to_vmem [thread:$0]  %s750_s2, 2048, %s42_s30, [#allocation6], %s658_s18, %s658_s18, %s659_s19  }
  0x25   :  { %651 = dma.done.wait [#allocation3], 256  }
  0x26   :  { %652 = vsyncadd [#allocation3], 4294967040 }
  0x27   :  { %653 = dma.done.wait [#allocation6], 2560  }
  0x28   :  { %654 = vsyncadd [#allocation6], 4294964736  ;;  %v664_v0 = vmov 0.0   ;;  %vm665_vm0 = vmmov 0   ;;  %v543_v1 = vld [vmem:[#allocation5 + $0x18] sm:$0xff]   ;;  %v544_v2 = vld [vmem:[#allocation5 + $0x10] sm:$0xff]   ;;  %v374_v44 = vlaneseq }
  0x29   :  { %481 = vmatprep.subr.bf16.mxu0 %v664_v0  ;;  %489 = vmatprep.mubr.msk.bf16.mxu0 %vm665_vm0, %v664_v0  ;;  %v547_v3 = vld [vmem:[#allocation7 + $0x38] sm:$0xff]   ;;  %v545_v4 = vld [vmem:[#allocation5 + $0x8] sm:$0xff]   ;;  %v548_v5 = vld [vmem:[#allocation7 + $0x30] sm:$0xff]   ;;  %vm102_vm1 = vcmask 523264  }
  0x2a   :  { %493 = vmatprep.subr.bf16.mxu1 %v664_v0  ;;  %509 = vmatprep.mubr.msk.bf16.mxu1 %vm665_vm0, %v664_v0  ;;  %v546_v6 = vld [vmem:[#allocation5] sm:$0xff]   ;;  %v60_v7 = vld [vmem:[#allocation2] sm:$0xff]  ;;  %v61_v8 = vld [vmem:[#allocation2 + $0x8] sm:$0xff]  ;;  %v375_v46 = vand.u32 127, %v374_v44 }
  0x2b   :  { %482 = vmatpush3.bf16.msra.mxu0 %v543_v1  ;;  %494 = vmatpush3.bf16.msra.mxu1 %v547_v3  ;;  %v549_v9 = vld [vmem:[#allocation7 + $0x28] sm:$0xff]   ;;  %v62_v10 = vpack.c.bf16 %v61_v8, %v60_v7  ;;  %v550_v11 = vld [vmem:[#allocation7 + $0x20] sm:$0xff]   ;;  %v551_v12 = vld [vmem:[#allocation7 + $0x18] sm:$0xff]  }
  0x2c   :  { %483 = vmatprep.subr.bf16.mxu0 %v664_v0  ;;  %495 = vmatprep.subr.bf16.mxu1 %v664_v0  ;;  %v552_v13 = vld [vmem:[#allocation7 + $0x10] sm:$0xff]   ;;  %v553_v14 = vld [vmem:[#allocation7 + $0x8] sm:$0xff]   ;;  %v554_v15 = vld [vmem:[#allocation7] sm:$0xff]   ;;  %vm376_vm2 = vcmp.lt.s32.totalorder %v375_v46, 10 }
  0x2d   :  { %v555_v16 = vld [vmem:[#allocation7 + $0x78] sm:$0xff]   ;;  %v556_v17 = vld [vmem:[#allocation7 + $0x70] sm:$0xff]   ;;  %v557_v18 = vld [vmem:[#allocation7 + $0x68] sm:$0xff]  }
  0x2e   :  { %v558_v19 = vld [vmem:[#allocation7 + $0x60] sm:$0xff]   ;;  %v559_v20 = vld [vmem:[#allocation7 + $0x58] sm:$0xff]   ;;  %v425_v21 = vld [vmem:[%s751_s3] ss:$0 sm:$0xff] }
  0x2f   :  { %484 = vmatpush3.bf16.msra.mxu0 %v544_v2  ;;  %496 = vmatpush3.bf16.msra.mxu1 %v548_v5  ;;  %v560_v31 = vld [vmem:[#allocation7 + $0x50] sm:$0xff]   ;;  %v561_v32 = vld [vmem:[#allocation7 + $0x48] sm:$0xff]   ;;  %v562_v33 = vld [vmem:[#allocation7 + $0x40] sm:$0xff]  }
  0x30   :  { %485 = vmatprep.subr.bf16.mxu0 %v664_v0  ;;  %497 = vmatprep.subr.bf16.mxu1 %v664_v0  ;;  %v431_v34 = vld [vmem:[%s751_s3 + $0x1] ss:$0 sm:$0xff]  ;;  %v440_v45 = vld [vmem:[%s751_s3 + $0x2] ss:$0 sm:$0xff]  ;;  %s666_s3 = smov [#allocation8]  }
  0x31   :  { %s412_s11 = sshll.u32 %s666_s3, 4  ;;  %s413_s11 = int_to_ptr.vmem [resolvable:$true] %s412_s11 }
  0x32   :  { %s631_s12 = scalar_lea.vmem %s413_s11, 128  ;;  %p636_p2 = scmp.lt.s32.totalorder %s413_s11, %s413_s11 }
  0x33   :  { %486 = vmatpush3.bf16.msra.mxu0 %v545_v4  ;;  %498 = vmatpush3.bf16.msra.mxu1 %v549_v9  ;;  %p632_p1 = scmp.ne.s32.totalorder %s413_s11, %s631_s12  ;;  %p637_p3 = scmp.lt.s32.totalorder %s631_s12, %s631_s12 }
  0x34   :  { %487 = vmatprep.subr.bf16.mxu0 %v664_v0  ;;  %499 = vmatprep.subr.bf16.mxu1 %v664_v0 }
  0x35   :  { %p638_p4 = por %p637_p3, %p636_p2 }
  0x37   :  { %488 = vmatpush3.bf16.msra.mxu0 %v546_v6  ;;  %500 = vmatpush3.bf16.msra.mxu1 %v550_v11  ;;  %p639_p5 = pnand %p638_p4, %p632_p1 }
  0x38   :  { %513 = vmatprep.subr.bf16.mxu0 %v664_v0  ;;  %501 = vmatprep.subr.bf16.mxu1 %v664_v0 }
  0x3a   :  { %490 = vmatmul.mubr.msk.bf16.vlgmr.msra.gmra.mxu0 %vm102_vm1, %v62_v10 }
  0x3b   :  { %529 = vmatprep.mubr.msk.bf16.mxu0 %vm665_vm0, %v664_v0  ;;  %502 = vmatpush3.bf16.msra.mxu1 %v551_v12 }
  0x3c   :  { %503 = vmatprep.subr.bf16.mxu1 %v664_v0  ;;  %514 = vmatpush3.bf16.msra.mxu0 %v555_v16 }
  0x3d   :  { %515 = vmatprep.subr.bf16.mxu0 %v664_v0 }
  0x3f   :  { %504 = vmatpush3.bf16.msra.mxu1 %v552_v13 }
  0x40   :  { %505 = vmatprep.subr.bf16.mxu1 %v664_v0  ;;  %516 = vmatpush3.bf16.msra.mxu0 %v556_v17 }
  0x41   :  { %517 = vmatprep.subr.bf16.mxu0 %v664_v0 }
  0x43   :  { %506 = vmatpush3.bf16.msra.mxu1 %v553_v14 }
  0x44   :  { %507 = vmatprep.subr.bf16.mxu1 %v664_v0  ;;  %518 = vmatpush3.bf16.msra.mxu0 %v557_v18 }
  0x45   :  { %519 = vmatprep.subr.bf16.mxu0 %v664_v0 }
  0x47   :  { %508 = vmatpush3.bf16.msra.mxu1 %v554_v15 }
  0x48   :  { %520 = vmatpush3.bf16.msra.mxu0 %v558_v19 }
  0x49   :  { %521 = vmatprep.subr.bf16.mxu0 %v664_v0 }
  0x4c   :  { %522 = vmatpush3.bf16.msra.mxu0 %v559_v20 }
  0x4d   :  { %523 = vmatprep.subr.bf16.mxu0 %v664_v0 }
  0x50   :  { %524 = vmatpush3.bf16.msra.mxu0 %v560_v31 }
  0x51   :  { %525 = vmatprep.subr.bf16.mxu0 %v664_v0 }
  0x54   :  { %526 = vmatpush3.bf16.msra.mxu0 %v561_v32 }
  0x55   :  { %527 = vmatprep.subr.bf16.mxu0 %v664_v0 }
  0x58   :  { %528 = vmatpush3.bf16.msra.mxu0 %v562_v33 }
  0xfa   :  { %v140_v22 = vpop.f32.mrf.mxu0 }
  0xfb   :  { %v141_v24 = vadd.f32 %v425_v21, %v140_v22 }
  0xfc   :  { %v491_v23 = vpop.f32.mrf.mxu0 }
  0xfd   :  { %v147_v28 = vmax.f32 %v141_v24, 0.0 }
  0xfe   :  { %v143_v25 = vpop.f32.mrf.mxu0 }
  0xff   :  { %v144_v26 = vadd.f32 %v425_v21, %v143_v25 }
 0x100   :  { %v492_v27 = vpop.f32.mrf.mxu0 }
 0x101   :  { %v148_v29 = vmax.f32 %v144_v26, 0.0 }
 0x103   :  { %v149_v30 = vpack.c.bf16 %v148_v29, %v147_v28 }
 0x105   :  { %510 = vmatmul.mubr.bf16.vlgmr.msra.gmra.mxu1 %v149_v30 }
 0x1c5   :  { %v252_v35 = vpop.f32.mrf.mxu1 }
 0x1c6   :  { %v253_v37 = vadd.f32 %v431_v34, %v252_v35 }
 0x1c7   :  { %v511_v36 = vpop.f32.mrf.mxu1 }
 0x1c8   :  { %v259_v41 = vmax.f32 %v253_v37, 0.0 }
 0x1c9   :  { %v255_v38 = vpop.f32.mrf.mxu1 }
 0x1ca   :  { %v256_v39 = vadd.f32 %v431_v34, %v255_v38 }
 0x1cb   :  { %v512_v40 = vpop.f32.mrf.mxu1 }
 0x1cc   :  { %v260_v42 = vmax.f32 %v256_v39, 0.0 }
 0x1ce   :  { %v261_v43 = vpack.c.bf16 %v260_v42, %v259_v41 }
 0x1d0   :  { %530 = vmatmul.mubr.bf16.vlgmr.msra.gmra.mxu0 %v261_v43 }
 0x290   :  { %v365_v47 = vpop.f32.mrf.mxu0 }
 0x291   :  { %v366_v48 = vadd.f32 %v440_v45, %v365_v47 }
 0x292   :  { %v531_v49 = vpop.f32.mrf.mxu0 }
 0x293   :  { %v372_v50 = vmax.f32 %v366_v48, 0.0 }
 0x294   :  { %v368_v51 = vpop.f32.mrf.mxu0 }
 0x295   :  { %v369_v52 = vadd.f32 %v440_v45, %v368_v51  ;;  %v377_v53 = vsel %vm376_vm2, %v372_v50, -1e+30 }
 0x296   :  { %379 = vmax.xlane.f32.xlu0 %v377_v53  ;;  %v532_v54 = vpop.f32.mrf.mxu0 }
 0x297   :  { %v373_v55 = vmax.f32 %v369_v52, 0.0 }
 0x299   :  { %v378_v56 = vsel %vm376_vm2, %v373_v55, -1e+30 }
 0x29a   :  { %381 = vmax.xlane.f32.xlu0 %v378_v56 }
 0x31f   :  { %v380_v57 = vpop.xlane.xlu0 %379 }
 0x320   :  { %v383_v58 = vsub.f32 %v377_v53, %v380_v57 }
 0x322   :  { %v385_v59 = vmul.f32 1.442695, %v383_v58 }
 0x323   :  { %v382_v60 = vpop.xlane.xlu0 %381 }
 0x324   :  { %563 = vpow2.f32 %v385_v59  ;;  %v384_v61 = vsub.f32 %v378_v56, %v382_v60 }
 0x326   :  { %v387_v62 = vmul.f32 1.442695, %v384_v61 }
 0x328   :  { %565 = vpow2.f32 %v387_v62 }
 0x331   :  { %v564_v63 = vpop.eup %563 }
 0x332   :  { %389 = vadd.xlane.f32.xlu1 %v564_v63 }
 0x335   :  { %v566_v0 = vpop.eup %565 }
 0x336   :  { %391 = vadd.xlane.f32.xlu1 %v566_v0 }
 0x3bb   :  { %v390_v1 = vpop.xlane.xlu1 %389 }
 0x3bc   :  { %567 = vrcp.f32 %v390_v1 }
 0x3bf   :  { %v392_v2 = vpop.xlane.xlu1 %391 }
 0x3c0   :  { %569 = vrcp.f32 %v392_v2 }
 0x3c9   :  { %v568_v3 = vpop.eup %567 }
 0x3ca   :  { %v395_v5 = vmul.f32 %v568_v3, %v564_v63 }
 0x3cd   :  { %v570_v4 = vpop.eup %569 }
 0x3ce   :  { %v396_v6 = vmul.f32 %v570_v4, %v566_v0 }
 0x3d0   :  { %v456_v7 = vpack.c.bf16 %v396_v6, %v395_v5 }
 0x3d2   :  { %457 = vst [vmem:[#allocation8] sm:$0xff] %v456_v7  }
 0x3d3   :  { %642 = shalt.err (!%p639_p5)
}
 0x3d4   :  { %418 = dma.vmem_to_hbm [thread:$0]  %s413_s11, 128, %s752_s4, [#allocation4], %s658_s18, %s658_s18, %s659_s19  }
 0x3d5   :  { %655 = dma.done.wait [#allocation4], 128  }
 0x3d6   :  { %656 = vsyncadd [#allocation4], 4294967168 }
 0x3d7   :  { %422 = vsyncpa [#allocation3], 1 }
 0x3d8   :  { %423 = vsyncpa [#allocation6], 1 }
 0x3d9   :  { %424 = vsyncpa [#allocation4], 1 }

</bundles_post_ra>
